<compile_context>
chip_gen: v5e
topology: v5e:2x2
jax: 0.10.0
libtpu: 0.0.40
codegen_flags: <defaults>
</compile_context>

<pallas_src>
import functools

import jax
import jax.numpy as jnp
from jax import lax
from jax.experimental import pallas as pl
from jax.experimental.pallas import tpu as pltpu


def _round_up(x, m):
    return (x + m - 1) // m * m


def _intent_kernel(tilemax_ref,                     # SMEM scalar prefetch: (num_tiles,)
                   tokens_ref, lengths_ref,         # VMEM: (TB, L) i32, (TB, 1) i32
                   fsa_ref, rsum_ref, vlane_ref,    # VMEM: transition data / constants
                   mat_ref, bias_ref,               # VMEM: (S, CPAD), (1, CPAD)
                   scores_ref,                      # VMEM out: (TB, CPAD)
                   *, wfa_type, clamp_hidden, clamp_score, S, V):
    i = pl.program_id(0)
    TB, L = tokens_ref.shape

    toks = tokens_ref[...]                                    # (TB, L) int32
    lens = lengths_ref[...]                                   # (TB, 1) int32
    l_iota = lax.broadcasted_iota(jnp.int32, (TB, L), 1)      # step index per lane

    # h0: one-hot at state 0 for every row of the tile.
    h0 = (lax.broadcasted_iota(jnp.int32, (TB, S), 1) == 0).astype(jnp.float32)

    # Max sequence length inside this batch tile -> dynamic loop trip count
    # (skips dead iterations past the longest row of the tile).
    tmax = tilemax_ref[i]

    if wfa_type == "viterbi":
        v_row = lax.broadcasted_iota(jnp.int32, (1, V), 1)

        def body(t, h):
            # Token id of step t for every row: masked lane reduce over L.
            tok_t = jnp.sum(jnp.where(l_iota == t, toks, 0), axis=1, keepdims=True)
            onehot = (v_row == tok_t).astype(jnp.float32)                 # (TB, V)
            # MXU one-hot gather of the per-row transition matrix, flat layout.
            tr = jnp.dot(onehot, fsa_ref[...],
                         preferred_element_type=jnp.float32)              # (TB, S*S)
            # max-mul: max_s h[b,s] * Tr[b,s,j], via static lane slices + max tree.
            prods = [h[:, s:s + 1] * tr[:, s * S:(s + 1) * S] for s in range(S)]
            while len(prods) > 1:
                nxt = [jnp.maximum(prods[a], prods[a + 1])
                       for a in range(0, len(prods) - 1, 2)]
                if len(prods) % 2:
                    nxt.append(prods[-1])
                prods = nxt
            h_new = prods[0]
            # Rows whose sequence already ended keep their final hidden state.
            return jnp.where(t < lens, h_new, h)
    else:
        v_lane = vlane_ref[...]                                # (1, V*S): lane -> vocab id

        def body(t, h):
            tok_t = jnp.sum(jnp.where(l_iota == t, toks, 0), axis=1, keepdims=True)
            # One big MXU matmul against all vocab transition matrices at once.
            big = jnp.dot(h, fsa_ref[...],
                          preferred_element_type=jnp.float32)             # (TB, V*S)
            # Keep only the lanes belonging to this row's token (VPU select).
            sel = jnp.where(v_lane == tok_t, big, 0.0)
            # Fold the V blocks back down to S states with a tiled identity (MXU).
            h_new = jnp.dot(sel, rsum_ref[...],
                            preferred_element_type=jnp.float32)           # (TB, S)
            return jnp.where(t < lens, h_new, h)

    h_last = lax.fori_loop(0, tmax, body, h0)

    if clamp_hidden:
        h_last = jnp.clip(h_last, 0.0, 1.0)
    scores = jnp.dot(h_last, mat_ref[...],
                     preferred_element_type=jnp.float32) + bias_ref[...]
    if clamp_score:
        scores = jnp.clip(scores, 0.0, 1.0)
    scores_ref[...] = scores                                   # lane-dense (TB, CPAD) store


def intent_integrate_onehot(tokens, lengths, fsa_tensor, mat, bias, *,
                            wfa_type="forward", clamp_hidden=True,
                            clamp_score=True, batch_tile=None):
    """Pallas implementation of IntentIntegrateOnehot.forward."""
    B, L = tokens.shape
    V, S, _ = fsa_tensor.shape
    C = mat.shape[1]

    if batch_tile is None:
        batch_tile = 128 if wfa_type != "viterbi" else 32   # viterbi keeps (TB,S*S) live
    tb = min(batch_tile, _round_up(B, 8))
    Bp = _round_up(B, tb)
    num_tiles = Bp // tb
    CPAD = _round_up(C, 128)                                 # lane-dense output width

    tokens = tokens.astype(jnp.int32)
    lengths = lengths.astype(jnp.int32)
    tokens_p = jnp.zeros((Bp, L), jnp.int32).at[:B].set(tokens)
    lengths_p = jnp.zeros((Bp, 1), jnp.int32).at[:B, 0].set(lengths)

    # Per-tile maximum sequence length -> SMEM scalar prefetch (loop trip count).
    tile_max = jnp.max(jnp.clip(lengths_p.reshape(num_tiles, tb), 0, L),
                       axis=1).astype(jnp.int32)

    fsa32 = fsa_tensor.astype(jnp.float32)
    if wfa_type == "viterbi":
        fsa_prepared = fsa32.reshape(V, S * S)                         # [v, s*S+j]
    else:
        fsa_prepared = jnp.transpose(fsa32, (1, 0, 2)).reshape(S, V * S)  # [s, v*S+j]
    rsum = jnp.tile(jnp.eye(S, dtype=jnp.float32), (V, 1))             # (V*S, S)
    v_of_lane = (jnp.arange(V * S, dtype=jnp.int32) // S).reshape(1, V * S)

    mat_p = jnp.zeros((S, CPAD), jnp.float32).at[:, :C].set(mat.astype(jnp.float32))
    bias_p = jnp.zeros((1, CPAD), jnp.float32).at[0, :C].set(
        bias.astype(jnp.float32).reshape(-1))

    kernel = functools.partial(
        _intent_kernel, wfa_type=wfa_type, clamp_hidden=clamp_hidden,
        clamp_score=clamp_score, S=S, V=V)

    grid_spec = pltpu.PrefetchScalarGridSpec(
        num_scalar_prefetch=1,                    # tile_max -> SMEM
        grid=(num_tiles,),
        in_specs=[
            pl.BlockSpec((tb, L), lambda i, tm: (i, 0)),               # tokens tile
            pl.BlockSpec((tb, 1), lambda i, tm: (i, 0)),               # lengths tile
            pl.BlockSpec(fsa_prepared.shape, lambda i, tm: (0, 0)),    # transitions (resident)
            pl.BlockSpec(rsum.shape, lambda i, tm: (0, 0)),            # tiled identity
            pl.BlockSpec(v_of_lane.shape, lambda i, tm: (0, 0)),       # lane -> vocab id
            pl.BlockSpec((S, CPAD), lambda i, tm: (0, 0)),             # mat (padded)
            pl.BlockSpec((1, CPAD), lambda i, tm: (0, 0)),             # bias (padded)
        ],
        out_specs=pl.BlockSpec((tb, CPAD), lambda i, tm: (i, 0)),
    )

    out = pl.pallas_call(
        kernel,
        grid_spec=grid_spec,
        out_shape=jax.ShapeDtypeStruct((Bp, CPAD), jnp.float32),
        compiler_params=pltpu.CompilerParams(
            dimension_semantics=("parallel",)),    # independent batch tiles (2 TCs on v7x)
    )(tile_max, tokens_p, lengths_p, fsa_prepared, rsum, v_of_lane, mat_p, bias_p)

    return out[:B, :C]


def reference_forward(tokens, lengths, fsa_tensor, mat, bias, *,
                      wfa_type="forward", clamp_hidden=True, clamp_score=True):
    """Pure-JAX reference mirroring the PyTorch module."""
    B, L = tokens.shape
    S = fsa_tensor.shape[1]
    hp = jax.lax.Precision.HIGHEST
    h = jnp.zeros((B, S), jnp.float32).at[:, 0].set(1.0)
    all_h = []
    for t in range(L):
        Tr = fsa_tensor[tokens[:, t]]                        # (B, S, S)
        if wfa_type == "viterbi":
            h = jnp.max(h[:, :, None] * Tr, axis=1)
        else:
            h = jnp.einsum("bs,bsj->bj", h, Tr, precision=hp)
        all_h.append(h)
    all_h = jnp.stack(all_h, axis=1)                         # (B, L, S)
    last = all_h[jnp.arange(B), lengths - 1, :]
    if clamp_hidden:
        last = jnp.clip(last, 0.0, 1.0)
    scores = jnp.dot(last, mat, precision=hp) + bias
    if clamp_score:
        scores = jnp.clip(scores, 0.0, 1.0)
    return scores


if __name__ == "__main__":
    # Small, module-consistent shapes.
    V, S, C = 16, 32, 8          # vocab, FSA states, intent classes
    B, L = 4, 8                  # batch, sequence length

    key = jax.random.PRNGKey(0)
    k_fsa, k_mat, k_bias, k_tok, k_len = jax.random.split(key, 5)

    # Scale transitions so hidden values stay in a numerically sensitive range.
    fsa_tensor = jax.random.uniform(k_fsa, (V, S, S), jnp.float32) * (2.0 / S)
    mat = jax.random.normal(k_mat, (S, C), jnp.float32)
    bias = jax.random.normal(k_bias, (C,), jnp.float32) * 0.05

    tokens = jax.random.randint(k_tok, (B, L), 0, V, dtype=jnp.int32)
    lengths = jax.random.randint(k_len, (B,), 1, L + 1, dtype=jnp.int32)

    ok = True
    for wfa in ("forward", "viterbi"):
        out = jax.block_until_ready(
            intent_integrate_onehot(tokens, lengths, fsa_tensor, mat, bias,
                                    wfa_type=wfa))
        ref = reference_forward(tokens, lengths, fsa_tensor, mat, bias,
                                wfa_type=wfa)
        ok = ok and bool(jnp.allclose(out, ref, atol=3e-3, rtol=1e-2))

    if ok:
        print("KERNEL_OK")
</pallas_src>

<mosaic_0001>
module attributes {stable_mosaic.version = 11 : i64} {
  func.func @_intent_kernel(%arg0: i32, %arg1: memref<1xi32, #tpu.memory_space<smem>>, %arg2: memref<8x8xi32, #tpu.memory_space<vmem>>, %arg3: memref<8x1xi32, #tpu.memory_space<vmem>>, %arg4: memref<32x512xf32, #tpu.memory_space<vmem>>, %arg5: memref<512x32xf32, #tpu.memory_space<vmem>>, %arg6: memref<1x512xi32, #tpu.memory_space<vmem>>, %arg7: memref<32x128xf32, #tpu.memory_space<vmem>>, %arg8: memref<1x128xf32, #tpu.memory_space<vmem>>, %arg9: memref<8x128xf32, #tpu.memory_space<vmem>>) attributes {dimension_semantics = [#tpu.dimension_semantics<parallel>], iteration_bounds = array<i64: 1>, scalar_prefetch = 1 : i64, scratch_operands = 0 : i64, tpu.core_type = #tpu.core_type<tc>, window_params = [{transform_indices = @transform_0, window_bounds = array<i64: 8, 8>}, {transform_indices = @transform_1, window_bounds = array<i64: 8, 1>}, {pipeline_mode = #tpu.pipeline_mode<synchronous>, transform_indices = @transform_2, window_bounds = array<i64: 32, 512>}, {pipeline_mode = #tpu.pipeline_mode<synchronous>, transform_indices = @transform_3, window_bounds = array<i64: 512, 32>}, {pipeline_mode = #tpu.pipeline_mode<synchronous>, transform_indices = @transform_4, window_bounds = array<i64: 1, 512>}, {pipeline_mode = #tpu.pipeline_mode<synchronous>, transform_indices = @transform_5, window_bounds = array<i64: 32, 128>}, {pipeline_mode = #tpu.pipeline_mode<synchronous>, transform_indices = @transform_6, window_bounds = array<i64: 1, 128>}, {transform_indices = @transform_7, window_bounds = array<i64: 8, 128>}]} {
    %c0 = arith.constant 0 : index
    %c0_0 = arith.constant 0 : index
    %0 = vector.load %arg2[%c0, %c0_0] : memref<8x8xi32, #tpu.memory_space<vmem>>, vector<8x8xi32>
    %c0_1 = arith.constant 0 : index
    %c0_2 = arith.constant 0 : index
    %1 = vector.load %arg3[%c0_1, %c0_2] : memref<8x1xi32, #tpu.memory_space<vmem>>, vector<8x1xi32>
    %2 = tpu.iota {dimensions = array<i32: 1>} : vector<8x8xi32>
    %3 = tpu.iota {dimensions = array<i32: 1>} : vector<8x32xi32>
    %c0_i32 = arith.constant 0 : i32
    %4 = vector.broadcast %c0_i32 : i32 to vector<8x32xi32>
    %5 = arith.cmpi eq, %3, %4 : vector<8x32xi32>
    %6 = arith.extui %5 : vector<8x32xi1> to vector<8x32xi32>
    %7 = arith.sitofp %6 : vector<8x32xi32> to vector<8x32xf32>
    %8 = arith.index_cast %arg0 : i32 to index
    %9 = memref.load %arg1[%8] : memref<1xi32, #tpu.memory_space<smem>>
    %c0_3 = arith.constant 0 : index
    %c0_4 = arith.constant 0 : index
    %10 = vector.load %arg6[%c0_3, %c0_4] : memref<1x512xi32, #tpu.memory_space<vmem>>, vector<1x512xi32>
    %c0_i32_5 = arith.constant 0 : i32
    %11 = arith.subi %9, %c0_i32_5 : i32
    %12 = arith.addi %c0_i32_5, %11 : i32
    %c1_i32 = arith.constant 1 : i32
    %13 = scf.for %arg10 = %c0_i32_5 to %12 step %c1_i32 iter_args(%arg11 = %7) -> (vector<8x32xf32>)  : i32 {
      %28 = vector.broadcast %arg10 : i32 to vector<8x8xi32>
      %29 = arith.cmpi eq, %2, %28 : vector<8x8xi32>
      %c0_i32_16 = arith.constant 0 : i32
      %30 = vector.broadcast %c0_i32_16 : i32 to vector<8x8xi32>
      %31 = arith.select %29, %0, %30 : vector<8x8xi1>, vector<8x8xi32>
      %cst_17 = arith.constant dense<0> : vector<8xi32>
      %32 = vector.multi_reduction <add>, %31, %cst_17 [1] : vector<8x8xi32> to vector<8xi32>
      %33 = vector.shape_cast %32 : vector<8xi32> to vector<8x1xi32>
      %c0_18 = arith.constant 0 : index
      %c0_19 = arith.constant 0 : index
      %34 = vector.load %arg4[%c0_18, %c0_19] : memref<32x512xf32, #tpu.memory_space<vmem>>, vector<32x512xf32>
      %cst_20 = arith.constant dense<0.000000e+00> : vector<8x512xf32>
      %35 = tpu.matmul %arg11, %34, %cst_20 {dimension_numbers = #tpu.dot_dimension_numbers<[1], [0], [0], [1], [0, 0, 1, 1], [], []>} : vector<8x32xf32>, vector<32x512xf32>, vector<8x512xf32> -> vector<8x512xf32>
      %36 = vector.broadcast %10 : vector<1x512xi32> to vector<8x512xi32>
      %37 = vector.broadcast %33 : vector<8x1xi32> to vector<8x512xi32>
      %38 = arith.cmpi eq, %36, %37 : vector<8x512xi32>
      %cst_21 = arith.constant 0.000000e+00 : f32
      %39 = vector.broadcast %cst_21 : f32 to vector<8x512xf32>
      %40 = arith.select %38, %35, %39 : vector<8x512xi1>, vector<8x512xf32>
      %c0_22 = arith.constant 0 : index
      %c0_23 = arith.constant 0 : index
      %41 = vector.load %arg5[%c0_22, %c0_23] : memref<512x32xf32, #tpu.memory_space<vmem>>, vector<512x32xf32>
      %cst_24 = arith.constant dense<0.000000e+00> : vector<8x32xf32>
      %42 = tpu.matmul %40, %41, %cst_24 {dimension_numbers = #tpu.dot_dimension_numbers<[1], [0], [0], [1], [0, 0, 1, 1], [], []>} : vector<8x512xf32>, vector<512x32xf32>, vector<8x32xf32> -> vector<8x32xf32>
      %43 = vector.broadcast %arg10 : i32 to vector<8x1xi32>
      %44 = arith.cmpi slt, %43, %1 : vector<8x1xi32>
      %45 = vector.shape_cast %44 : vector<8x1xi1> to vector<8x1xi1>
      %46 = vector.broadcast %45 : vector<8x1xi1> to vector<8x32xi1>
      %47 = arith.select %46, %42, %arg11 : vector<8x32xi1>, vector<8x32xf32>
      scf.yield %47 : vector<8x32xf32>
    }
    %cst = arith.constant 0.000000e+00 : f32
    %cst_6 = arith.constant 1.000000e+00 : f32
    %14 = vector.broadcast %cst : f32 to vector<8x32xf32>
    %15 = arith.maximumf %14, %13 : vector<8x32xf32>
    %16 = vector.broadcast %cst_6 : f32 to vector<8x32xf32>
    %17 = arith.minimumf %16, %15 : vector<8x32xf32>
    %c0_7 = arith.constant 0 : index
    %c0_8 = arith.constant 0 : index
    %18 = vector.load %arg7[%c0_7, %c0_8] : memref<32x128xf32, #tpu.memory_space<vmem>>, vector<32x128xf32>
    %cst_9 = arith.constant dense<0.000000e+00> : vector<8x128xf32>
    %19 = tpu.matmul %17, %18, %cst_9 {dimension_numbers = #tpu.dot_dimension_numbers<[1], [0], [0], [1], [0, 0, 1, 1], [], []>} : vector<8x32xf32>, vector<32x128xf32>, vector<8x128xf32> -> vector<8x128xf32>
    %c0_10 = arith.constant 0 : index
    %c0_11 = arith.constant 0 : index
    %20 = vector.load %arg8[%c0_10, %c0_11] : memref<1x128xf32, #tpu.memory_space<vmem>>, vector<1x128xf32>
    %21 = vector.broadcast %20 : vector<1x128xf32> to vector<8x128xf32>
    %22 = arith.addf %19, %21 : vector<8x128xf32>
    %cst_12 = arith.constant 0.000000e+00 : f32
    %cst_13 = arith.constant 1.000000e+00 : f32
    %23 = vector.broadcast %cst_12 : f32 to vector<8x128xf32>
    %24 = arith.maximumf %23, %22 : vector<8x128xf32>
    %25 = vector.broadcast %cst_13 : f32 to vector<8x128xf32>
    %26 = arith.minimumf %25, %24 : vector<8x128xf32>
    %c0_14 = arith.constant 0 : index
    %c0_15 = arith.constant 0 : index
    %27 = vector.load %arg9[%c0_14, %c0_15] : memref<8x128xf32, #tpu.memory_space<vmem>>, vector<8x128xf32>
    tpu.vector_store %arg9[%c0_14, %c0_15], %26 {strides = array<i32>} : memref<8x128xf32, #tpu.memory_space<vmem>>, vector<8x128xf32>,
    return
  }
  func.func @transform_0(%arg0: i32, %arg1: memref<1xi32, #tpu.memory_space<smem>>) -> (i32, i32) {
    %c0_i32 = arith.constant 0 : i32
    %c0_i32_0 = arith.constant 0 : i32
    return %arg0, %c0_i32 : i32, i32
  }
  func.func @transform_1(%arg0: i32, %arg1: memref<1xi32, #tpu.memory_space<smem>>) -> (i32, i32) {
    %c0_i32 = arith.constant 0 : i32
    %c0_i32_0 = arith.constant 0 : i32
    return %arg0, %c0_i32 : i32, i32
  }
  func.func @transform_2(%arg0: i32, %arg1: memref<1xi32, #tpu.memory_space<smem>>) -> (i32, i32) {
    %c0_i32 = arith.constant 0 : i32
    %c0_i32_0 = arith.constant 0 : i32
    %c0_i32_1 = arith.constant 0 : i32
    return %c0_i32, %c0_i32_0 : i32, i32
  }
  func.func @transform_3(%arg0: i32, %arg1: memref<1xi32, #tpu.memory_space<smem>>) -> (i32, i32) {
    %c0_i32 = arith.constant 0 : i32
    %c0_i32_0 = arith.constant 0 : i32
    %c0_i32_1 = arith.constant 0 : i32
    return %c0_i32, %c0_i32_0 : i32, i32
  }
  func.func @transform_4(%arg0: i32, %arg1: memref<1xi32, #tpu.memory_space<smem>>) -> (i32, i32) {
    %c0_i32 = arith.constant 0 : i32
    %c0_i32_0 = arith.constant 0 : i32
    %c0_i32_1 = arith.constant 0 : i32
    return %c0_i32, %c0_i32_0 : i32, i32
  }
  func.func @transform_5(%arg0: i32, %arg1: memref<1xi32, #tpu.memory_space<smem>>) -> (i32, i32) {
    %c0_i32 = arith.constant 0 : i32
    %c0_i32_0 = arith.constant 0 : i32
    %c0_i32_1 = arith.constant 0 : i32
    return %c0_i32, %c0_i32_0 : i32, i32
  }
  func.func @transform_6(%arg0: i32, %arg1: memref<1xi32, #tpu.memory_space<smem>>) -> (i32, i32) {
    %c0_i32 = arith.constant 0 : i32
    %c0_i32_0 = arith.constant 0 : i32
    %c0_i32_1 = arith.constant 0 : i32
    return %c0_i32, %c0_i32_0 : i32, i32
  }
  func.func @transform_7(%arg0: i32, %arg1: memref<1xi32, #tpu.memory_space<smem>>) -> (i32, i32) {
    %c0_i32 = arith.constant 0 : i32
    %c0_i32_0 = arith.constant 0 : i32
    return %arg0, %c0_i32 : i32, i32
  }
}

</mosaic_0001>

<bundles_post_ra>
// kernel: tpu_custom_call.1
= control target key start
LH: loop header
LB: loop body
LE: loop exit
PB: predicated region body
PF: predicated region fallthrough
CT: control target
= control target key end

     0   :  { %14 = vsyncpa [#allocation5], 0  ;;  %v31_v2 = vlaneseq  ;;  %v477_v5 = vmov 0.0   ;;  %s848_s0 = inlined_call_operand.<no memory space> [shape: s32[1], index: 0, kind: input, shape index: {}]   ;;  %s849_s1 = inlined_call_operand.vmem [shape: s32[8,8], index: 1, kind: input, shape index: {}]   ;;  %s850_s2 = inlined_call_operand.vmem [shape: s32[8,1], index: 2, kind: input, shape index: {}]   ;;  %s851_s3 = inlined_call_operand.vmem [shape: f32[32,512], index: 3, kind: input, shape index: {}]   ;;  %s852_s4 = inlined_call_operand.vmem [shape: f32[512,32], index: 4, kind: input, shape index: {}]   ;;  %s853_s5 = inlined_call_operand.vmem [shape: s32[1,512], index: 5, kind: input, shape index: {}]   ;;  %s854_s6 = inlined_call_operand.vmem [shape: f32[32,128], index: 6, kind: input, shape index: {}]   ;;  %s855_s7 = inlined_call_operand.vmem [shape: f32[1,128], index: 7, kind: input, shape index: {}]   ;;  %s856_s8 = inlined_call_operand.hbm [shape: f32[8,128], index: 8, kind: output, shape index: {}]  }
   0x1   :  { %v528_v0 = vld [vmem:[%s849_s1] sm:$0xff]  ;;  %p387_p0 = scmp.le.s32.totalorder %s848_s0, 0 }
   0x2   :  { %v533_v1 = vld [vmem:[%s850_s2] sm:$0xff]  ;;  %v540_v4 = vand.u32 127, %v31_v2  ;;  %s550_s2 = smov (!%p387_p0), 0  }
   0x3   :  { %v538_v3 = vld [vmem:[%s853_s5] sm:$0xf]  ;;  %381 = sbr.rel (%p387_p0) target bundleno = 286 (0x11e), region = 49 }
   0x4   :  { %vm33_vm0 = vcmp.eq.s32.totalorder %v540_v4, 0 }
   0x5   :  { %v386_v6 = vsel %vm33_vm0, 1.0, %v477_v5  }
   0x6   :  { %v857_v7 = vmov %v386_v6 }
   0x8 LB: > { %v76_v8 = vld [vmem:[%s851_s3 + $0x70] sm:$0xff]  ;;  %v77_v9 = vld [vmem:[%s851_s3 + $0x78] sm:$0xff]  ;;  %v74_v14 = vld [vmem:[%s851_s3 + $0x60] sm:$0xff]  ;;  %v45_v16 = vstv %s471_s2  ;;  %vm48_vm1 = vcmask 64512   ;;  %vm78_vm3 = vcmask 261120   ;;  %s41_s2 = sadd.s32 1, %s471_s2   ;;  %s471_s2 = sphi %s550_s2, %s41_s2   ;;  %v467_v6 = vphi %v386_v6, %v858_v6  }
   0x9   : > { %v72_v10 = vld [vmem:[%s851_s3 + $0x50] sm:$0xff]  ;;  %134 = vmatpush.msra.mxu2 %v76_v8  ;;  %154 = vmatpush.msra.mxu3 %v77_v9  ;;  %v73_v11 = vld [vmem:[%s851_s3 + $0x58] sm:$0xff]  ;;  %v75_v15 = vld [vmem:[%s851_s3 + $0x68] sm:$0xff]  ;;  %vm46_vm2 = vcmp.eq.s32.totalorder %v540_v4, %v45_v16  ;;  %vm318_vm4 = vcmp.lt.s32.totalorder %v45_v16, %v533_v1  ;;  %p40_p1 = scmp.ge.s32.totalorder %s41_s2, %s848_s0 }
   0xa   : > { %v68_v12 = vld [vmem:[%s851_s3 + $0x30] sm:$0xff]  ;;  %v69_v13 = vld [vmem:[%s851_s3 + $0x38] sm:$0xff]  ;;  %v70_v17 = vld [vmem:[%s851_s3 + $0x40] sm:$0xff]  ;;  %94 = vmatpush.msra.mxu0 %v74_v14  ;;  %114 = vmatpush.msra.mxu1 %v75_v15  ;;  %v47_v21 = vsel %vm46_vm2, %v528_v0, 0 }
   0xb   : > { %135 = vmatpush.msra.mxu2 %v72_v10  ;;  %155 = vmatpush.msra.mxu3 %v73_v11  ;;  %v71_v18 = vld [vmem:[%s851_s3 + $0x48] sm:$0xff]  ;;  %v64_v19 = vld [vmem:[%s851_s3 + $0x10] sm:$0xff]  ;;  %v65_v20 = vld [vmem:[%s851_s3 + $0x18] sm:$0xff]  ;;  %v49_v22 = vsel %vm48_vm1, %v47_v21, 0 }
   0xc   : > { %95 = vmatpush.msra.mxu0 %v70_v17  ;;  %115 = vmatpush.msra.mxu1 %v71_v18  ;;  %v66_v23 = vld [vmem:[%s851_s3 + $0x20] sm:$0xff]  ;;  %v67_v24 = vld [vmem:[%s851_s3 + $0x28] sm:$0xff]  ;;  %v51_v25 = vshrl.u32 %v49_v22, 16  ;;  %v221_v26 = vld [vmem:[%s852_s4 + $0x178] sm:$0xff]  ;;  %v50_v30 = vand.u32 65535, %v49_v22 }
   0xd   : > { %136 = vmatpush.msra.mxu2 %v68_v12  ;;  %156 = vmatpush.msra.mxu3 %v69_v13  ;;  %v62_v28 = vld [vmem:[%s851_s3] sm:$0xff]  ;;  %v63_v29 = vld [vmem:[%s851_s3 + $0x8] sm:$0xff]  ;;  %v189_v31 = vld [vmem:[%s852_s4 + $0x78] sm:$0xff] }
   0xe   : > { %v53_v27 = vcvt.s32.f32 %v51_v25  ;;  %96 = vmatpush.msra.mxu0 %v66_v23  ;;  %116 = vmatpush.msra.mxu1 %v67_v24  ;;  %v205_v32 = vld [vmem:[%s852_s4 + $0xf8] sm:$0xff]  ;;  %v220_v34 = vld [vmem:[%s852_s4 + $0x170] sm:$0xff]  ;;  %v219_v38 = vld [vmem:[%s852_s4 + $0x168] sm:$0xff]  ;;  %v52_v39 = vcvt.s32.f32 %v50_v30 }
   0xf   : > { %137 = vmatpush.msra.mxu2 %v64_v19  ;;  %157 = vmatpush.msra.mxu3 %v65_v20  ;;  %v237_v33 = vld [vmem:[%s852_s4 + $0x1f8] sm:$0xff]  ;;  %v188_v35 = vld [vmem:[%s852_s4 + $0x70] sm:$0xff]  ;;  %v187_v40 = vld [vmem:[%s852_s4 + $0x68] sm:$0xff] }
  0x10   : > { %390 = vmatmul.msk.f32.vlgmr.msra.gmra.mxu2 %vm78_vm3, %v467_v6  ;;  %391 = vmatmul.msk.f32.vlgmr.msra.gmra.mxu3 %vm78_vm3, %v467_v6  ;;  %v204_v36 = vld [vmem:[%s852_s4 + $0xf0] sm:$0xff]  ;;  %v203_v41 = vld [vmem:[%s852_s4 + $0xe8] sm:$0xff]  ;;  %v186_v43 = vld [vmem:[%s852_s4 + $0x60] sm:$0xff] }
  0x11   : > { %56 = vadd.xlane.f32.xlu0 %v53_v27  ;;  %278 = vmatpush.msrb.mxu2 %v221_v26  ;;  %v236_v37 = vld [vmem:[%s852_s4 + $0x1f0] sm:$0xff]  ;;  %v235_v42 = vld [vmem:[%s852_s4 + $0x1e8] sm:$0xff]  ;;  %v202_v44 = vld [vmem:[%s852_s4 + $0xe0] sm:$0xff] }
  0x12   : > { %97 = vmatpush.msra.mxu0 %v62_v28  ;;  %117 = vmatpush.msra.mxu1 %v63_v29  ;;  %v218_v45 = vld [vmem:[%s852_s4 + $0x160] sm:$0xff]  ;;  %v185_v47 = vld [vmem:[%s852_s4 + $0x58] sm:$0xff]  ;;  %v184_v51 = vld [vmem:[%s852_s4 + $0x50] sm:$0xff] }
  0x13   : > { %388 = vmatmul.msk.f32.vlgmr.msra.gmra.mxu0 %vm78_vm3, %v467_v6  ;;  %389 = vmatmul.msk.f32.vlgmr.msra.gmra.mxu1 %vm78_vm3, %v467_v6  ;;  %v234_v46 = vld [vmem:[%s852_s4 + $0x1e0] sm:$0xff]  ;;  %v201_v48 = vld [vmem:[%s852_s4 + $0xd8] sm:$0xff]  ;;  %v200_v52 = vld [vmem:[%s852_s4 + $0xd0] sm:$0xff] }
  0x14   : > { %238 = vmatpush.msrb.mxu0 %v189_v31  ;;  %258 = vmatpush.msrb.mxu1 %v205_v32  ;;  %v217_v49 = vld [vmem:[%s852_s4 + $0x158] sm:$0xff]  ;;  %v216_v53 = vld [vmem:[%s852_s4 + $0x150] sm:$0xff]  ;;  %v183_v55 = vld [vmem:[%s852_s4 + $0x48] sm:$0xff] }
  0x15   : > { %298 = vmatpush.msrb.mxu3 %v237_v33  ;;  %279 = vmatpush.msrb.mxu2 %v220_v34  ;;  %v233_v50 = vld [vmem:[%s852_s4 + $0x1d8] sm:$0xff]  ;;  %v232_v54 = vld [vmem:[%s852_s4 + $0x1d0] sm:$0xff]  ;;  %v199_v56 = vld [vmem:[%s852_s4 + $0xc8] sm:$0xff] }
  0x16   : > { %239 = vmatpush.msrb.mxu0 %v188_v35  ;;  %259 = vmatpush.msrb.mxu1 %v204_v36  ;;  %v215_v57 = vld [vmem:[%s852_s4 + $0x148] sm:$0xff]  ;;  %v182_v59 = vld [vmem:[%s852_s4 + $0x40] sm:$0xff]  ;;  %v181_v63 = vld [vmem:[%s852_s4 + $0x38] sm:$0xff] }
  0x17   : > { %299 = vmatpush.msrb.mxu3 %v236_v37  ;;  %280 = vmatpush.msrb.mxu2 %v219_v38  ;;  %v231_v58 = vld [vmem:[%s852_s4 + $0x1c8] sm:$0xff]  ;;  %v198_v60 = vld [vmem:[%s852_s4 + $0xc0] sm:$0xff]  ;;  %v197_v2 = vld [vmem:[%s852_s4 + $0xb8] sm:$0xff]  ;;  %v478_v37 = vmov 0  }
  0x18   : > { %240 = vmatpush.msrb.mxu0 %v187_v40  ;;  %260 = vmatpush.msrb.mxu1 %v203_v41  ;;  %v214_v61 = vld [vmem:[%s852_s4 + $0x140] sm:$0xff]  ;;  %v213_v5 = vld [vmem:[%s852_s4 + $0x138] sm:$0xff]  ;;  %v180_v8 = vld [vmem:[%s852_s4 + $0x30] sm:$0xff]  ;;  %v319_v38 = vsel %vm318_vm4, 1, %v478_v37 }
  0x19   : > { %54 = vadd.xlane.f32.xlu0 %v52_v39  ;;  %300 = vmatpush.msrb.mxu3 %v235_v42  ;;  %v230_v62 = vld [vmem:[%s852_s4 + $0x1c0] sm:$0xff]  ;;  %v229_v7 = vld [vmem:[%s852_s4 + $0x1b8] sm:$0xff]  ;;  %v196_v9 = vld [vmem:[%s852_s4 + $0xb0] sm:$0xff]  ;;  %v162_v42 = vperm.slane %v538_v3, 0 }
  0x1a   : > { %241 = vmatpush.msrb.mxu0 %v186_v43  ;;  %261 = vmatpush.msrb.mxu1 %v202_v44  ;;  %v212_v10 = vld [vmem:[%s852_s4 + $0x130] sm:$0xff]  ;;  %v179_v12 = vld [vmem:[%s852_s4 + $0x28] sm:$0xff]  ;;  %v178_v17 = vld [vmem:[%s852_s4 + $0x20] sm:$0xff]  ;;  %v163_v43 = vperm.slane %v538_v3, 1 }
  0x1b   : > { %281 = vmatpush.msrb.mxu2 %v218_v45  ;;  %301 = vmatpush.msrb.mxu3 %v234_v46  ;;  %v228_v11 = vld [vmem:[%s852_s4 + $0x1b0] sm:$0xff]  ;;  %v195_v13 = vld [vmem:[%s852_s4 + $0xa8] sm:$0xff]  ;;  %v194_v18 = vld [vmem:[%s852_s4 + $0xa0] sm:$0xff]  ;;  %v164_v46 = vperm.slane %v538_v3, 2 }
  0x1c   : > { %242 = vmatpush.msrb.mxu0 %v185_v47  ;;  %262 = vmatpush.msrb.mxu1 %v201_v48  ;;  %v211_v14 = vld [vmem:[%s852_s4 + $0x128] sm:$0xff]  ;;  %v210_v19 = vld [vmem:[%s852_s4 + $0x120] sm:$0xff]  ;;  %v177_v21 = vld [vmem:[%s852_s4 + $0x18] sm:$0xff]  ;;  %v165_v47 = vperm.slane %v538_v3, 3 }
  0x1d   : > { %282 = vmatpush.msrb.mxu2 %v217_v49  ;;  %302 = vmatpush.msrb.mxu3 %v233_v50  ;;  %v227_v15 = vld [vmem:[%s852_s4 + $0x1a8] sm:$0xff]  ;;  %v226_v20 = vld [vmem:[%s852_s4 + $0x1a0] sm:$0xff]  ;;  %v193_v22 = vld [vmem:[%s852_s4 + $0x98] sm:$0xff] }
  0x1e   : > { %243 = vmatpush.msrb.mxu0 %v184_v51  ;;  %263 = vmatpush.msrb.mxu1 %v200_v52  ;;  %v209_v23 = vld [vmem:[%s852_s4 + $0x118] sm:$0xff]  ;;  %v176_v25 = vld [vmem:[%s852_s4 + $0x10] sm:$0xff]  ;;  %v175_v29 = vld [vmem:[%s852_s4 + $0x8] sm:$0xff] }
  0x1f   : > { %283 = vmatpush.msrb.mxu2 %v216_v53  ;;  %303 = vmatpush.msrb.mxu3 %v232_v54  ;;  %v225_v24 = vld [vmem:[%s852_s4 + $0x198] sm:$0xff]  ;;  %v192_v26 = vld [vmem:[%s852_s4 + $0x90] sm:$0xff]  ;;  %v191_v30 = vld [vmem:[%s852_s4 + $0x88] sm:$0xff] }
  0x20   : > { %244 = vmatpush.msrb.mxu0 %v183_v55  ;;  %264 = vmatpush.msrb.mxu1 %v199_v56  ;;  %v208_v27 = vld [vmem:[%s852_s4 + $0x110] sm:$0xff]  ;;  %v207_v31 = vld [vmem:[%s852_s4 + $0x108] sm:$0xff]  ;;  %v174_v33 = vld [vmem:[%s852_s4] sm:$0xff] }
  0x21   : > { %284 = vmatpush.msrb.mxu2 %v215_v57  ;;  %304 = vmatpush.msrb.mxu3 %v231_v58  ;;  %v224_v28 = vld [vmem:[%s852_s4 + $0x190] sm:$0xff]  ;;  %v223_v32 = vld [vmem:[%s852_s4 + $0x188] sm:$0xff]  ;;  %v190_v34 = vld [vmem:[%s852_s4 + $0x80] sm:$0xff] }
  0x22   : > { %245 = vmatpush.msrb.mxu0 %v182_v59  ;;  %265 = vmatpush.msrb.mxu1 %v198_v60  ;;  %v206_v35 = vld [vmem:[%s852_s4 + $0x100] sm:$0xff] }
  0x23   : > { %285 = vmatpush.msrb.mxu2 %v214_v61  ;;  %305 = vmatpush.msrb.mxu3 %v230_v62  ;;  %v222_v36 = vld [vmem:[%s852_s4 + $0x180] sm:$0xff] }
  0x24   : > { %246 = vmatpush.msrb.mxu0 %v181_v63  ;;  %266 = vmatpush.msrb.mxu1 %v197_v2 }
  0x25   : > { %286 = vmatpush.msrb.mxu2 %v213_v5  ;;  %306 = vmatpush.msrb.mxu3 %v229_v7 }
  0x26   : > { %247 = vmatpush.msrb.mxu0 %v180_v8  ;;  %267 = vmatpush.msrb.mxu1 %v196_v9 }
  0x27   : > { %287 = vmatpush.msrb.mxu2 %v212_v10  ;;  %307 = vmatpush.msrb.mxu3 %v228_v11 }
  0x28   : > { %248 = vmatpush.msrb.mxu0 %v179_v12  ;;  %268 = vmatpush.msrb.mxu1 %v195_v13 }
  0x29   : > { %288 = vmatpush.msrb.mxu2 %v211_v14  ;;  %308 = vmatpush.msrb.mxu3 %v227_v15 }
  0x2a   : > { %249 = vmatpush.msrb.mxu0 %v178_v17  ;;  %269 = vmatpush.msrb.mxu1 %v194_v18 }
  0x2b   : > { %289 = vmatpush.msrb.mxu2 %v210_v19  ;;  %309 = vmatpush.msrb.mxu3 %v226_v20 }
  0x2c   : > { %250 = vmatpush.msrb.mxu0 %v177_v21  ;;  %270 = vmatpush.msrb.mxu1 %v193_v22 }
  0x2d   : > { %290 = vmatpush.msrb.mxu2 %v209_v23  ;;  %310 = vmatpush.msrb.mxu3 %v225_v24 }
  0x2e   : > { %251 = vmatpush.msrb.mxu0 %v176_v25  ;;  %271 = vmatpush.msrb.mxu1 %v192_v26 }
  0x2f   : > { %291 = vmatpush.msrb.mxu2 %v208_v27  ;;  %311 = vmatpush.msrb.mxu3 %v224_v28 }
  0x30   : > { %252 = vmatpush.msrb.mxu0 %v175_v29  ;;  %272 = vmatpush.msrb.mxu1 %v191_v30 }
  0x31   : > { %292 = vmatpush.msrb.mxu2 %v207_v31  ;;  %312 = vmatpush.msrb.mxu3 %v223_v32 }
  0x32   : > { %253 = vmatpush.msrb.mxu0 %v174_v33  ;;  %273 = vmatpush.msrb.mxu1 %v190_v34 }
  0x33   : > { %293 = vmatpush.msrb.mxu2 %v206_v35  ;;  %313 = vmatpush.msrb.mxu3 %v222_v36 }
  0x34   : > { %424 = vset.pattern.permute.xlu1 %v478_v37  ;;  %425 = vset.pattern.permute.xlu0 %v478_v37 }
  0x35   : > { %321 = vperm.xlu1 %424, %v319_v38  }
  0x84   : > { %v57_v39 = vpop.xlane.xlu0 %56 }
  0x85   : > { %v59_v40 = vcvt.f32.s32 %v57_v39 }
  0x87   : > { %v60_v44 = vshll.u32 %v59_v40, 16 }
  0x8c   : > { %v55_v41 = vpop.xlane.xlu0 %54 }
  0x8d   : > { %v58_v45 = vcvt.f32.s32 %v55_v41 }
  0x8f   : > { %v61_v48 = vadd.s32 %v60_v44, %v58_v45 }
  0x90   : > { %v99_v16 = vpop.f32.mrf.mxu0  ;;  %v119_v49 = vpop.f32.mrf.mxu1 }
  0x91   : > { %vm166_vm5 = vcmp.eq.s32.totalorder %v162_v42, %v61_v48  ;;  %vm167_vm6 = vcmp.eq.s32.totalorder %v163_v43, %v61_v48  ;;  %vm168_vm7 = vcmp.eq.s32.totalorder %v164_v46, %v61_v48  ;;  %vm169_vm8 = vcmp.eq.s32.totalorder %v165_v47, %v61_v48 }
  0x92   : > { %392 = vmatmul.msk.f32.vlgmr.msrb.gmra.mxu0 %vm166_vm5, %v99_v16  ;;  %393 = vmatmul.msk.f32.vlgmr.msrb.gmra.mxu1 %vm167_vm6, %v119_v49 }
  0x93   : > { %v139_v50 = vpop.f32.mrf.mxu2  ;;  %v159_v51 = vpop.f32.mrf.mxu3 }
  0x94   : > { %394 = vmatmul.msk.f32.vlgmr.msrb.gmra.mxu2 %vm168_vm7, %v139_v50  ;;  %395 = vmatmul.msk.f32.vlgmr.msrb.gmra.mxu3 %vm169_vm8, %v159_v51 }
  0xa7   : > { %v322_v55 = vpop.permute.xlu1 %321 }
  0xa8   : > { %vm323_vm9 = vcmp.eq.s32.totalorder %v322_v55, 1 }
 0x10f   : > { %v255_v52 = vpop.f32.mrf.mxu0  ;;  %v275_v53 = vpop.f32.mrf.mxu1 }
 0x110   : > { %v276_v54 = vadd.f32 %v275_v53, %v255_v52 }
 0x117   : > { %v295_v56 = vpop.f32.mrf.mxu2  ;;  %v315_v58 = vpop.f32.mrf.mxu3 }
 0x118   : > { %v296_v57 = vadd.f32 %v295_v56, %v276_v54 }
 0x119   :  { %43 = sbr.rel (!%p40_p1) target bundleno = 8 (0x8), region = 55 }
 0x11a   : > { %v316_v59 = vadd.f32 %v315_v58, %v296_v57 }
 0x11c   : > { %v324_v60 = vsel %vm323_vm9, %v316_v59, %v467_v6  }
 0x11d   : > { %v858_v6 = vmov %v324_v60  ;;  %v859_v7 = vmov (%p40_p1), %v324_v60 }
 0x11e PF:  { %v330_v6 = vld [vmem:[%s854_s6 + $0x18] sm:$0xff]  ;;  %v329_v61 = vld [vmem:[%s854_s6 + $0x10] sm:$0xff]  ;;  %v325_v62 = vmax.f32 %v475_v7, 0.0  ;;  %v328_v63 = vld [vmem:[%s854_s6 + $0x8] sm:$0xff]  ;;  %vm335_vm10 = vcmask 261120   ;;  %s479_s5 = smov [#allocation4]   ;;  %v475_v7 = vphi %v857_v7, %v859_v7  }
 0x11f   :  { %351 = vmatpush.msra.mxu0 %v330_v6  ;;  %v327_v0 = vld [vmem:[%s854_s6] sm:$0xff]  ;;  %s367_s12 = sshll.u32 %s479_s5, 4  ;;  %s369_s15 = sshll.u32 %s856_s8, 4  ;;  %s368_s12 = int_to_ptr.vmem [resolvable:$true] %s367_s12  ;;  %s370_s15 = int_to_ptr.hbm [resolvable:$true] %s369_s15 }
 0x120   :  { %v326_v1 = vmin.f32 %v325_v62, 1.0  ;;  %v426_v3 = vld [vmem:[%s855_s7] ss:$0 sm:$0xff] }
 0x121   :  { %352 = vmatpush.msra.mxu0 %v329_v61 }
 0x123   :  { %353 = vmatpush.msra.mxu0 %v328_v63 }
 0x125   :  { %354 = vmatpush.msra.mxu0 %v327_v0 }
 0x126   :  { %396 = vmatmul.msk.f32.vlgmr.msra.gmra.mxu0 %vm335_vm10, %v326_v1 }
 0x1a3   :  { %v356_v4 = vpop.f32.mrf.mxu0 }
 0x1a4   :  { %v357_v2 = vadd.f32 %v426_v3, %v356_v4 }
 0x1a6   :  { %v359_v5 = vmax.f32 %v357_v2, 0.0 }
 0x1a8   :  { %v360_v7 = vmin.f32 %v359_v5, 1.0 }
 0x1aa   :  { %361 = vst [vmem:[#allocation4] sm:$0xff] %v360_v7 }
 0x1ab   :  { %372 = dma.vmem_to_hbm [thread:$0]  %s368_s12, 128, %s370_s15, [#allocation5]  }
 0x1ac   :  { %463 = dma.done.wait [#allocation5], 128  }
 0x1ad   :  { %464 = vsyncadd [#allocation5], 4294967168 }
 0x1ae   :  { %377 = vsyncpa [#allocation5], 1 }

</bundles_post_ra>
